<compile_context>
chip_gen: v7x
topology: tpu7x:2x2x1
jax: 0.10.0
libtpu: 0.0.40
codegen_flags: <defaults>
</compile_context>

<pallas_src>
import functools

import jax
import jax.numpy as jnp
from jax.experimental import pallas as pl
from jax.experimental.pallas import tpu as pltpu

_LANE = 128
_SUBLANE = 8
_SUBTILE = _SUBLANE * _LANE          # pad granule -> tiles reshape to (.., 8, 128)
_TARGET_TILE_BYTES = 2 << 20         # ~2 MiB / input tile; x2 inputs x2 bufs = 8 MiB


def _num_tensorcores() -> int:
    """Best-effort TensorCores-per-chip (v7x has 2; v5e/v6e have 1)."""
    try:
        info = pltpu.get_tpu_info()
        for name in ("num_cores", "core_count", "num_tensorcores"):
            v = getattr(info, name, None)
            if isinstance(v, int) and v in (1, 2):
                return v
    except Exception:
        pass
    try:
        if "v7" in jax.devices()[0].device_kind.lower():
            return 2
    except Exception:
        pass
    return 1


def _bce_kernel(pred_ref, gt_ref, out_ref, *, n, block_elems,
                blocks_per_partial, n_full_blocks):
    """Accumulate per-lane partial BCE sums into the resident (8,128) out block."""
    c = pl.program_id(0)                 # partial / TensorCore axis
    t = pl.program_id(1)                 # tile axis within the partial
    blk = c * blocks_per_partial + t     # global tile index (may overhang; masked)

    @pl.when(t == 0)
    def _():
        out_ref[...] = jnp.zeros_like(out_ref)

    # Upcast in-kernel so narrow (e.g. bf16) inputs stay narrow in HBM.
    p = pred_ref[...].astype(jnp.float32)
    g = gt_ref[...].astype(jnp.float32)

    # PyTorch BCELoss clamps the log terms at -100 for numerical stability.
    log_p = jnp.maximum(jnp.log(p), -100.0)
    log_1mp = jnp.maximum(jnp.log(1.0 - p), -100.0)
    # Fused blend: -(g*log_p + (1-g)*log_1mp) == -(log_1mp + g*(log_p - log_1mp))
    loss = -(log_1mp + g * (log_p - log_1mp))

    # Interior tiles (every element valid): plain per-lane accumulate, no mask.
    @pl.when(blk < n_full_blocks)
    def _():
        out_ref[...] += loss.reshape(-1, _SUBLANE, _LANE).sum(axis=0)

    # Edge tiles only: ragged last block, lane/sublane padding past n, or
    # clamped-overhang duplicate tiles.  Keep this a select (not multiply) so
    # unspecified VMEM read past the array can never propagate.
    @pl.when(blk >= n_full_blocks)
    def _():
        rows_blk, lanes = loss.shape
        row_idx = jax.lax.broadcasted_iota(jnp.int32, loss.shape, 0)
        lane_idx = jax.lax.broadcasted_iota(jnp.int32, loss.shape, 1)
        rem = n - blk * block_elems      # valid elements remaining in this block
        masked = jnp.where(row_idx * lanes + lane_idx < rem, loss, 0.0)
        out_ref[...] += masked.reshape(-1, _SUBLANE, _LANE).sum(axis=0)


def binary_cross_entropy_loss(pred: jax.Array, gt: jax.Array,
                              scale_factor: float = 1.0) -> jax.Array:
    """scale_factor * mean(BCE(pred, gt)), matching nn.BCELoss(reduction='mean')."""
    assert pred.shape == gt.shape, "pred and gt must have the same shape"
    n = pred.size
    assert n > 0

    # Free reshape to 1-D; keep the HBM-resident dtype (upcast happens in-kernel).
    pred_f = jnp.ravel(pred)
    gt_f = jnp.ravel(gt)

    # Pad only to the next (8,128) granule (<= 1023 elements).  Padded values
    # are irrelevant: the kernel masks every element past n (0.5 avoids log(0)).
    padded = pl.cdiv(n, _SUBTILE) * _SUBTILE
    if padded != n:
        pad = padded - n
        pred_f = jnp.pad(pred_f, (0, pad), constant_values=0.5)
        gt_f = jnp.pad(gt_f, (0, pad))

    rows = padded // _LANE
    pred2d = pred_f.reshape(rows, _LANE)
    gt2d = gt_f.reshape(rows, _LANE)

    # Dtype-aware tile: keep tile *bytes* (not rows) constant at ~2 MiB.
    itemsize = max(pred2d.dtype.itemsize, gt2d.dtype.itemsize)
    max_rows = max(_SUBLANE,
                   (_TARGET_TILE_BYTES // (_LANE * itemsize)) // _SUBLANE * _SUBLANE)
    block_rows = min(rows, max_rows)
    block_elems = block_rows * _LANE
    num_blocks = pl.cdiv(rows, block_rows)
    n_full_blocks = n // block_elems     # blocks entirely below n need no mask

    # Split across TensorCores only where a second TC actually exists (v7x).
    num_partials = min(_num_tensorcores(), num_blocks)
    blocks_per_partial = pl.cdiv(num_blocks, num_partials)

    def in_map(c, t):
        # Clamp so overhanging (c, t) steps re-read the last valid tile; the
        # kernel's edge-tile mask zeroes their contribution.
        return (jnp.minimum(c * blocks_per_partial + t, num_blocks - 1), 0)

    kernel = functools.partial(
        _bce_kernel, n=n, block_elems=block_elems,
        blocks_per_partial=blocks_per_partial, n_full_blocks=n_full_blocks)

    if num_partials > 1:
        dims = (getattr(pltpu, "CORE_PARALLEL", "parallel"),
                getattr(pltpu, "ARBITRARY", "arbitrary"))
    else:
        dims = ("arbitrary", "arbitrary")

    bytes_accessed = int(pred2d.size * pred2d.dtype.itemsize
                         + gt2d.size * gt2d.dtype.itemsize
                         + num_partials * _SUBTILE * 4)
    cost = pl.CostEstimate(flops=8 * n, transcendentals=2 * n,
                           bytes_accessed=bytes_accessed)

    partials = pl.pallas_call(
        kernel,
        out_shape=jax.ShapeDtypeStruct((num_partials, _SUBLANE, _LANE), jnp.float32),
        grid_spec=pltpu.PrefetchScalarGridSpec(
            num_scalar_prefetch=0,
            grid=(num_partials, blocks_per_partial),
            in_specs=[
                pl.BlockSpec((block_rows, _LANE), in_map),
                pl.BlockSpec((block_rows, _LANE), in_map),
            ],
            out_specs=pl.BlockSpec((None, _SUBLANE, _LANE), lambda c, t: (c, 0, 0)),
        ),
        compiler_params=pltpu.CompilerParams(dimension_semantics=dims),
        cost_estimate=cost,
    )(pred2d, gt2d)

    # Single cross-lane reduce outside the kernel; fold mean + scale into one constant.
    return jnp.sum(partials) * jnp.float32(scale_factor / n)


def _reference(pred, gt, scale_factor=1.0):
    p = pred.astype(jnp.float32)
    g = gt.astype(jnp.float32)
    log_p = jnp.maximum(jnp.log(p), -100.0)
    log_1mp = jnp.maximum(jnp.log(1.0 - p), -100.0)
    return scale_factor * jnp.mean(-(g * log_p + (1.0 - g) * log_1mp))


if __name__ == "__main__":
    key = jax.random.PRNGKey(0)
    k1, k2, k3, k4, k5, k6 = jax.random.split(key, 6)

    # Small NCHW-shaped inputs, like a segmentation head output after sigmoid.
    shape = (2, 4, 16, 16)
    pred = jax.nn.sigmoid(jax.random.normal(k1, shape, dtype=jnp.float32))
    gt = (jax.random.uniform(k2, shape) > 0.5).astype(jnp.float32)
    loss = jax.block_until_ready(binary_cross_entropy_loss(pred, gt, scale_factor=1.0))
    ref = _reference(pred, gt, 1.0)
    assert jnp.allclose(loss, ref, rtol=1e-5, atol=1e-6), (loss, ref)

    # Odd-sized input exercises the lane-padding / edge-tile masking path.
    shape2 = (3, 5, 7)
    pred2 = jax.nn.sigmoid(jax.random.normal(k3, shape2, dtype=jnp.float32))
    gt2 = (jax.random.uniform(k4, shape2) > 0.5).astype(jnp.float32)
    loss2 = jax.block_until_ready(binary_cross_entropy_loss(pred2, gt2, scale_factor=2.5))
    ref2 = _reference(pred2, gt2, 2.5)
    assert jnp.allclose(loss2, ref2, rtol=1e-5, atol=1e-6), (loss2, ref2)

    # Multi-tile input exercises interior (unmasked) tiles + a ragged edge tile.
    shape3 = (5, 24, 100, 50)          # 600000 elements -> 2 tiles at 4096 f32 rows
    pred3 = jax.nn.sigmoid(jax.random.normal(k5, shape3, dtype=jnp.float32))
    gt3 = (jax.random.uniform(k6, shape3) > 0.5).astype(jnp.float32)
    loss3 = jax.block_until_ready(binary_cross_entropy_loss(pred3, gt3, scale_factor=1.0))
    ref3 = _reference(pred3, gt3, 1.0)
    assert jnp.allclose(loss3, ref3, rtol=1e-4, atol=1e-6), (loss3, ref3)

    print("KERNEL_OK")
</pallas_src>

<mosaic_0001>
module attributes {stable_mosaic.version = 11 : i64} {
  func.func @_bce_kernel(%arg0: i32, %arg1: i32, %arg2: memref<16x128xf32, #tpu.memory_space<vmem>>, %arg3: memref<16x128xf32, #tpu.memory_space<vmem>>, %arg4: memref<1x8x128xf32, #tpu.memory_space<vmem>>) attributes {dimension_semantics = [#tpu.dimension_semantics<arbitrary>, #tpu.dimension_semantics<arbitrary>], iteration_bounds = array<i64: 1, 1>, scalar_prefetch = 0 : i64, scratch_operands = 0 : i64, tpu.core_type = #tpu.core_type<tc>, window_params = [{transform_indices = @transform_0, window_bounds = array<i64: 16, 128>}, {transform_indices = @transform_1, window_bounds = array<i64: 16, 128>}, {transform_indices = @transform_2, window_bounds = array<i64: 1, 8, 128>}]} {
    %c1_i32 = arith.constant 1 : i32
    %0 = arith.muli %arg0, %c1_i32 : i32
    %1 = arith.addi %0, %arg1 : i32
    %c0_i32 = arith.constant 0 : i32
    %2 = arith.cmpi eq, %arg1, %c0_i32 : i32
    %3 = arith.extui %2 : i1 to i32
    %c0_i32_0 = arith.constant 0 : i32
    %4 = arith.cmpi ne, %3, %c0_i32_0 : i32
    scf.if %4 {
      %cst_11 = arith.constant 0.000000e+00 : f32
      %26 = vector.broadcast %cst_11 : f32 to vector<8x128xf32>
      %c0_12 = arith.constant 0 : index
      %c0_13 = arith.constant 0 : index
      %c0_14 = arith.constant 0 : index
      %27 = vector.load %arg4[%c0_12, %c0_13, %c0_14] : memref<1x8x128xf32, #tpu.memory_space<vmem>>, vector<1x8x128xf32>
      %28 = vector.shape_cast %27 : vector<1x8x128xf32> to vector<8x128xf32>
      %29 = vector.shape_cast %26 : vector<8x128xf32> to vector<1x8x128xf32>
      tpu.vector_store %arg4[%c0_12, %c0_13, %c0_14], %29 {strides = array<i32>} : memref<1x8x128xf32, #tpu.memory_space<vmem>>, vector<1x8x128xf32>,
    } else {
    }
    %c0 = arith.constant 0 : index
    %c0_1 = arith.constant 0 : index
    %5 = vector.load %arg2[%c0, %c0_1] : memref<16x128xf32, #tpu.memory_space<vmem>>, vector<16x128xf32>
    %c0_2 = arith.constant 0 : index
    %c0_3 = arith.constant 0 : index
    %6 = vector.load %arg3[%c0_2, %c0_3] : memref<16x128xf32, #tpu.memory_space<vmem>>, vector<16x128xf32>
    %7 = math.log %5 : vector<16x128xf32>
    %cst = arith.constant -1.000000e+02 : f32
    %8 = vector.broadcast %cst : f32 to vector<16x128xf32>
    %9 = arith.maximumf %7, %8 : vector<16x128xf32>
    %cst_4 = arith.constant 1.000000e+00 : f32
    %10 = vector.broadcast %cst_4 : f32 to vector<16x128xf32>
    %11 = arith.subf %10, %5 : vector<16x128xf32>
    %12 = math.log %11 : vector<16x128xf32>
    %cst_5 = arith.constant -1.000000e+02 : f32
    %13 = vector.broadcast %cst_5 : f32 to vector<16x128xf32>
    %14 = arith.maximumf %12, %13 : vector<16x128xf32>
    %15 = arith.subf %9, %14 : vector<16x128xf32>
    %16 = arith.mulf %6, %15 : vector<16x128xf32>
    %17 = arith.addf %14, %16 : vector<16x128xf32>
    %cst_6 = arith.constant 0.000000e+00 : f32
    %18 = vector.broadcast %cst_6 : f32 to vector<16x128xf32>
    %19 = arith.subf %18, %17 : vector<16x128xf32>
    %c1_i32_7 = arith.constant 1 : i32
    %20 = arith.cmpi slt, %1, %c1_i32_7 : i32
    %21 = arith.extui %20 : i1 to i32
    %c0_i32_8 = arith.constant 0 : i32
    %22 = arith.cmpi ne, %21, %c0_i32_8 : i32
    scf.if %22 {
      %c0_11 = arith.constant 0 : index
      %c0_12 = arith.constant 0 : index
      %c0_13 = arith.constant 0 : index
      %26 = vector.load %arg4[%c0_11, %c0_12, %c0_13] : memref<1x8x128xf32, #tpu.memory_space<vmem>>, vector<1x8x128xf32>
      %27 = vector.shape_cast %26 : vector<1x8x128xf32> to vector<8x128xf32>
      %28 = vector.shape_cast %19 : vector<16x128xf32> to vector<2x8x128xf32>
      %cst_14 = arith.constant dense<0.000000e+00> : vector<8x128xf32>
      %29 = vector.multi_reduction <add>, %28, %cst_14 [0] : vector<2x8x128xf32> to vector<8x128xf32>
      %30 = arith.addf %27, %29 : vector<8x128xf32>
      %c0_15 = arith.constant 0 : index
      %c0_16 = arith.constant 0 : index
      %c0_17 = arith.constant 0 : index
      %31 = vector.load %arg4[%c0_15, %c0_16, %c0_17] : memref<1x8x128xf32, #tpu.memory_space<vmem>>, vector<1x8x128xf32>
      %32 = vector.shape_cast %31 : vector<1x8x128xf32> to vector<8x128xf32>
      %33 = vector.shape_cast %30 : vector<8x128xf32> to vector<1x8x128xf32>
      tpu.vector_store %arg4[%c0_15, %c0_16, %c0_17], %33 {strides = array<i32>} : memref<1x8x128xf32, #tpu.memory_space<vmem>>, vector<1x8x128xf32>,
    } else {
    }
    %c1_i32_9 = arith.constant 1 : i32
    %23 = arith.cmpi sge, %1, %c1_i32_9 : i32
    %24 = arith.extui %23 : i1 to i32
    %c0_i32_10 = arith.constant 0 : i32
    %25 = arith.cmpi ne, %24, %c0_i32_10 : i32
    scf.if %25 {
      %26 = tpu.iota {dimensions = array<i32: 0>} : vector<16x128xi32>
      %27 = tpu.iota {dimensions = array<i32: 1>} : vector<16x128xi32>
      %c2048_i32 = arith.constant 2048 : i32
      %28 = arith.muli %1, %c2048_i32 : i32
      %c2048_i32_11 = arith.constant 2048 : i32
      %29 = arith.subi %c2048_i32_11, %28 : i32
      %c128_i32 = arith.constant 128 : i32
      %30 = vector.broadcast %c128_i32 : i32 to vector<16x128xi32>
      %31 = arith.muli %26, %30 : vector<16x128xi32>
      %32 = arith.addi %31, %27 : vector<16x128xi32>
      %33 = vector.broadcast %29 : i32 to vector<16x128xi32>
      %34 = arith.cmpi slt, %32, %33 : vector<16x128xi32>
      %cst_12 = arith.constant 0.000000e+00 : f32
      %35 = vector.broadcast %cst_12 : f32 to vector<16x128xf32>
      %36 = arith.select %34, %19, %35 : vector<16x128xi1>, vector<16x128xf32>
      %c0_13 = arith.constant 0 : index
      %c0_14 = arith.constant 0 : index
      %c0_15 = arith.constant 0 : index
      %37 = vector.load %arg4[%c0_13, %c0_14, %c0_15] : memref<1x8x128xf32, #tpu.memory_space<vmem>>, vector<1x8x128xf32>
      %38 = vector.shape_cast %37 : vector<1x8x128xf32> to vector<8x128xf32>
      %39 = vector.shape_cast %36 : vector<16x128xf32> to vector<2x8x128xf32>
      %cst_16 = arith.constant dense<0.000000e+00> : vector<8x128xf32>
      %40 = vector.multi_reduction <add>, %39, %cst_16 [0] : vector<2x8x128xf32> to vector<8x128xf32>
      %41 = arith.addf %38, %40 : vector<8x128xf32>
      %c0_17 = arith.constant 0 : index
      %c0_18 = arith.constant 0 : index
      %c0_19 = arith.constant 0 : index
      %42 = vector.load %arg4[%c0_17, %c0_18, %c0_19] : memref<1x8x128xf32, #tpu.memory_space<vmem>>, vector<1x8x128xf32>
      %43 = vector.shape_cast %42 : vector<1x8x128xf32> to vector<8x128xf32>
      %44 = vector.shape_cast %41 : vector<8x128xf32> to vector<1x8x128xf32>
      tpu.vector_store %arg4[%c0_17, %c0_18, %c0_19], %44 {strides = array<i32>} : memref<1x8x128xf32, #tpu.memory_space<vmem>>, vector<1x8x128xf32>,
    } else {
    }
    return
  }
  func.func @transform_0(%arg0: i32, %arg1: i32) -> (i32, i32) {
    %c1_i32 = arith.constant 1 : i32
    %0 = arith.muli %arg0, %c1_i32 : i32
    %1 = arith.addi %0, %arg1 : i32
    %c0_i32 = arith.constant 0 : i32
    %2 = arith.minsi %1, %c0_i32 : i32
    %c0_i32_0 = arith.constant 0 : i32
    %c0_i32_1 = arith.constant 0 : i32
    return %2, %c0_i32_0 : i32, i32
  }
  func.func @transform_1(%arg0: i32, %arg1: i32) -> (i32, i32) {
    %c1_i32 = arith.constant 1 : i32
    %0 = arith.muli %arg0, %c1_i32 : i32
    %1 = arith.addi %0, %arg1 : i32
    %c0_i32 = arith.constant 0 : i32
    %2 = arith.minsi %1, %c0_i32 : i32
    %c0_i32_0 = arith.constant 0 : i32
    %c0_i32_1 = arith.constant 0 : i32
    return %2, %c0_i32_0 : i32, i32
  }
  func.func @transform_2(%arg0: i32, %arg1: i32) -> (i32, i32, i32) {
    %c0_i32 = arith.constant 0 : i32
    %c0_i32_0 = arith.constant 0 : i32
    %c0_i32_1 = arith.constant 0 : i32
    return %arg0, %c0_i32, %c0_i32_0 : i32, i32, i32
  }
}

</mosaic_0001>

<bundles_post_ra>
// kernel: tpu_custom_call.1
= control target key start
LH: loop header
LB: loop body
LE: loop exit
PB: predicated region body
PF: predicated region fallthrough
CT: control target
= control target key end

     0   :  { %7 = vsyncpa [#allocation3], 0  ;;  %s286_s0 = inlined_call_operand.hbm [shape: f32[16,128], index: 0, kind: input, shape index: {}]   ;;  %s287_s1 = inlined_call_operand.hbm [shape: f32[16,128], index: 1, kind: input, shape index: {}]   ;;  %s288_s2 = inlined_call_operand.hbm [shape: f32[1,8,128], index: 2, kind: output, shape index: {}]  }
   0x1   :  { %8 = vsyncpa [#allocation6], 0 }
   0x2   :  { %9 = vsyncpa [#allocation4], 0  ;;  %s230_s9 = smov [#allocation2]   ;;  %s158_s13 = scalar_lea.hbm %s286_s0, 256 }
   0x3   :  { %s21_s10 = sshll.u32 %s230_s9, 4  ;;  %p159_p0 = scmp.ne.s32.totalorder %s286_s0, %s158_s13  ;;  %s22_s10 = int_to_ptr.vmem [resolvable:$true] %s21_s10 }
   0x4   :  { %p162_p1 = scmp.lt.u32.totalorder %s158_s13, %s286_s0 }
   0x6   :  { %p164_p2 = pnand %p162_p1, %p159_p0 }
   0x8   :  { %167 = shalt.err (!%p164_p2)
}
   0x9   :  { %s168_s18 = scalar_lea.vmem %s22_s10, 256  ;;  %p173_p4 = scmp.lt.s32.totalorder %s22_s10, %s22_s10 }
   0xa   :  { %p169_p3 = scmp.ne.s32.totalorder %s22_s10, %s168_s18  ;;  %p174_p5 = scmp.lt.s32.totalorder %s168_s18, %s168_s18 }
   0xc   :  { %p175_p6 = por %p174_p5, %p173_p4 }
   0xe   :  { %p176_p7 = pnand %p175_p6, %p169_p3 }
  0x10   :  { %179 = shalt.err (!%p176_p7)
}
  0x11   :  { %s231_s19 = smov 128   ;;  %s232_s20 = smov 8  }
  0x12   :  { %27 = dma.hbm_to_vmem [thread:$0]  %s286_s0, 256, %s22_s10, [#allocation3], %s231_s19, %s231_s19, %s232_s20  }
  0x13   :  { %s233_s23 = smov [#allocation5]   ;;  %s180_s27 = scalar_lea.hbm %s287_s1, 256 }
  0x14   :  { %s39_s24 = sshll.u32 %s233_s23, 4  ;;  %p181_p8 = scmp.ne.s32.totalorder %s287_s1, %s180_s27  ;;  %s40_s24 = int_to_ptr.vmem [resolvable:$true] %s39_s24 }
  0x15   :  { %p184_p9 = scmp.lt.u32.totalorder %s180_s27, %s287_s1 }
  0x17   :  { %p186_p10 = pnand %p184_p9, %p181_p8 }
  0x19   :  { %189 = shalt.err (!%p186_p10)
}
  0x1a   :  { %s190_s4 = scalar_lea.vmem %s40_s24, 256  ;;  %p195_p12 = scmp.lt.s32.totalorder %s40_s24, %s40_s24 }
  0x1b   :  { %p191_p11 = scmp.ne.s32.totalorder %s40_s24, %s190_s4  ;;  %p196_p13 = scmp.lt.s32.totalorder %s190_s4, %s190_s4 }
  0x1d   :  { %p197_p0 = por %p196_p13, %p195_p12 }
  0x1f   :  { %p198_p1 = pnand %p197_p0, %p191_p11 }
  0x21   :  { %201 = shalt.err (!%p198_p1)
}
  0x22   :  { %45 = dma.hbm_to_vmem [thread:$0]  %s287_s1, 256, %s40_s24, [#allocation6], %s231_s19, %s231_s19, %s232_s20  }
  0x23   :  { %224 = dma.done.wait [#allocation3], 256  }
  0x24   :  { %225 = vsyncadd [#allocation3], 4294967040 }
  0x25   :  { %226 = dma.done.wait [#allocation6], 256  }
  0x26   :  { %227 = vsyncadd [#allocation6], 4294967040  ;;  %v66_v0 = vld [vmem:[#allocation2] sm:$0xff]  ;;  %v67_v1 = vld [vmem:[#allocation2 + $0x8] sm:$0xff]  ;;  %s234_s1 = smov [#allocation7]  }
  0x27   :  { %150 = vlog2.f32 %v66_v0  ;;  %v76_v2 = vsub.f32 1.0, %v66_v0  ;;  %v77_v3 = vsub.f32 1.0, %v67_v1  ;;  %v68_v15 = vld [vmem:[#allocation5] sm:$0xff]  ;;  %v69_v17 = vld [vmem:[#allocation5 + $0x8] sm:$0xff]  ;;  %s130_s6 = sshll.u32 %s234_s1, 4  ;;  %s131_s6 = int_to_ptr.vmem [resolvable:$true] %s130_s6 }
  0x28   :  { %152 = vlog2.f32 %v67_v1  ;;  %s202_s7 = scalar_lea.vmem %s131_s6, 128  ;;  %p207_p3 = scmp.lt.s32.totalorder %s131_s6, %s131_s6 }
  0x29   :  { %154 = vlog2.f32 %v76_v2  ;;  %p203_p2 = scmp.ne.s32.totalorder %s131_s6, %s202_s7  ;;  %p208_p4 = scmp.lt.s32.totalorder %s202_s7, %s202_s7 }
  0x2a   :  { %156 = vlog2.f32 %v77_v3 }
  0x2b   :  { %p209_p5 = por %p208_p4, %p207_p3 }
  0x2d   :  { %p210_p6 = pnand %p209_p5, %p203_p2 }
  0x31   :  { %v151_v4 = vpop.eup %150 }
  0x32   :  { %v153_v5 = vpop.eup %152  ;;  %v71_v6 = vmul.f32 0.6931472, %v151_v4 }
  0x33   :  { %v155_v7 = vpop.eup %154  ;;  %v73_v8 = vmul.f32 0.6931472, %v153_v5 }
  0x34   :  { %v157_v9 = vpop.eup %156  ;;  %v74_v10 = vmax.f32 %v71_v6, -100.0  ;;  %v79_v11 = vmul.f32 0.6931472, %v155_v7 }
  0x35   :  { %v75_v12 = vmax.f32 %v73_v8, -100.0  ;;  %v81_v13 = vmul.f32 0.6931472, %v157_v9 }
  0x36   :  { %v82_v14 = vmax.f32 %v79_v11, -100.0 }
  0x37   :  { %v83_v16 = vmax.f32 %v81_v13, -100.0 }
  0x38   :  { %v84_v18 = vsub.f32 %v74_v10, %v82_v14 }
  0x39   :  { %v85_v19 = vsub.f32 %v75_v12, %v83_v16 }
  0x3a   :  { %v86_v20 = vmul.f32 %v84_v18, %v68_v15 }
  0x3b   :  { %v87_v21 = vmul.f32 %v85_v19, %v69_v17 }
  0x3c   :  { %v88_v22 = vadd.f32 %v86_v20, %v82_v14 }
  0x3d   :  { %v89_v23 = vadd.f32 %v87_v21, %v83_v16 }
  0x3e   :  { %v90_v24 = vsub.f32 0.0, %v88_v22 }
  0x3f   :  { %v91_v25 = vsub.f32 0.0, %v89_v23 }
  0x41   :  { %v97_v26 = vadd.f32 %v91_v25, %v90_v24 }
  0x43   :  { %99 = vst [vmem:[#allocation7] sm:$0xff] %v97_v26 }
  0x44   :  { %213 = shalt.err (!%p210_p6)
}
  0x45   :  { %s214_s10 = scalar_lea.hbm %s288_s2, 128 }
  0x46   :  { %p215_p7 = scmp.ne.s32.totalorder %s288_s2, %s214_s10  ;;  %p218_p8 = scmp.lt.u32.totalorder %s214_s10, %s288_s2 }
  0x48   :  { %p220_p9 = pnand %p218_p8, %p215_p7 }
  0x4a   :  { %223 = shalt.err (!%p220_p9)
}
  0x4b   :  { %133 = dma.vmem_to_hbm [thread:$0]  %s131_s6, 128, %s288_s2, [#allocation4]  }
  0x4c   :  { %228 = dma.done.wait [#allocation4], 128  }
  0x4d   :  { %229 = vsyncadd [#allocation4], 4294967168 }
  0x4e   :  { %137 = vsyncpa [#allocation3], 1 }
  0x4f   :  { %138 = vsyncpa [#allocation6], 1 }
  0x50   :  { %139 = vsyncpa [#allocation4], 1 }

</bundles_post_ra>
